<compile_context>
chip_gen: v6e
topology: v6e:2x2x1
jax: 0.10.0
libtpu: 0.0.40
codegen_flags: <defaults>
</compile_context>

<pallas_src>
import functools

import jax
import jax.numpy as jnp
from jax import lax
from jax.experimental import pallas as pl
from jax.experimental.pallas import tpu as pltpu


def user_encoder_kernel(
    uid_ref, age_ref, gen_ref, occ_ref, zip_ref,              # [B,1] int32 (VMEM)
    emb_u_ref, emb_a_ref, emb_g_ref, emb_o_ref, emb_z_ref,    # tables (VMEM)
    bias_row_ref,                                             # [1, num_users] f32 (VMEM)
    w_u_ref, w_a_ref, w_g_ref, w_o_ref, w_z_ref,              # [d_f, out_pad] (VMEM)
    b_ref,                                                    # [1, out_pad]  (VMEM)
    out_ref,                                                  # [B, out_pad]  (VMEM)
    *, out_dim,
):
    B, out_pad = out_ref.shape
    f32 = jnp.float32

    def one_hot_bool(idx_ref, n_rows):
        iota = lax.broadcasted_iota(jnp.int32, (B, n_rows), 1)
        return iota == idx_ref[...]                           # [B, n_rows] bool

    def gathered_proj(idx_ref, emb_ref, w_ref_):
        oh_b = one_hot_bool(idx_ref, emb_ref.shape[0])
        oh = oh_b.astype(f32)
        # One-hot matmul gather of the B needed embedding rows (MXU, vectorized).
        # NOTE: on v6e/v7x at larger sizes, cast `e` and the W slices to bf16
        # (keeping preferred_element_type=f32) for full MXU throughput.
        e = jnp.dot(oh, emb_ref[...], preferred_element_type=f32)   # [B, d_f]
        e = jnp.maximum(e, 0.0)                                     # ReLU
        # TODO(synk): torch.nn.Dropout applied as identity (inference mode);
        # the train-mode Bernoulli mask of the reference is not reproducible.
        y = jnp.dot(e, w_ref_[...], preferred_element_type=f32)     # [B, out_pad]
        return y, oh_b

    # relu(concat(...)) @ W  ==  sum_f relu(e_f) @ W[o_f:o_f+d_f, :]
    y, oh_u_bool = gathered_proj(uid_ref, emb_u_ref, w_u_ref)
    y = y + gathered_proj(age_ref, emb_a_ref, w_a_ref)[0]
    y = y + gathered_proj(gen_ref, emb_g_ref, w_g_ref)[0]
    y = y + gathered_proj(occ_ref, emb_o_ref, w_o_ref)[0]
    y = y + gathered_proj(zip_ref, emb_z_ref, w_z_ref)[0]
    y = y + b_ref[...]                                  # padded cols of b are zero

    # Exact user-bias gather: select the one matching lane and reduce (XLU).
    bias_sel = jnp.where(oh_u_bool, bias_row_ref[...], 0.0)         # [B, num_users]
    user_bias = jnp.sum(bias_sel, axis=1, keepdims=True)            # [B, 1]

    # Pack user_bias into column `out_dim` of the lane-dense output slab.
    bias_col_mask = lax.broadcasted_iota(jnp.int32, (1, out_pad), 1) == out_dim
    out_ref[...] = y + jnp.where(bias_col_mask, user_bias, 0.0)


def user_encoder(user_id, age, gender, occupation, zip_area,
                 emb_users, emb_age, emb_gender, emb_occupation, emb_zip,
                 bias_user, W, b):
    """W: [fc_in, common_dim] (transposed vs torch), b: [common_dim],
    bias_user: [num_users] (flattened bias embedding table)."""
    B = user_id.shape[0]
    dims = (emb_users.shape[1], emb_age.shape[1], emb_gender.shape[1],
            emb_occupation.shape[1], emb_zip.shape[1])
    out_dim = W.shape[1]

    LANES, SUBLANES = 128, 8
    out_pad = pl.cdiv(out_dim + 1, LANES) * LANES    # +1 lane packs user_bias
    B_pad = pl.cdiv(B, SUBLANES) * SUBLANES          # f32 sublane alignment

    def prep_idx(x):
        x = x.astype(jnp.int32)
        return jnp.pad(x, (0, B_pad - B)).reshape(B_pad, 1)

    idx = [prep_idx(v) for v in (user_id, age, gender, occupation, zip_area)]

    # Lane-pad W / b to out_pad and split W into per-feature row blocks in the
    # wrapper (XLA; constant-folded for fixed weights) so the kernel never
    # slices across (8,128) VMEM tile boundaries.
    W_pad = jnp.pad(W.astype(jnp.float32), ((0, 0), (0, out_pad - out_dim)))
    b_pad = jnp.pad(b.astype(jnp.float32).reshape(1, -1),
                    ((0, 0), (0, out_pad - out_dim)))
    offs = [0]
    for d in dims[:-1]:
        offs.append(offs[-1] + d)
    W_parts = [lax.slice_in_dim(W_pad, o, o + d, axis=0)
               for o, d in zip(offs, dims)]
    bias_row = bias_user.astype(jnp.float32).reshape(1, -1)

    # TODO(synk): for realistic vocabularies (millions of users) keep emb_users
    # in HBM (memory_space=pl.ANY) and DMA-gather only the B needed rows with
    # scalar-prefetched indices; whole-table VMEM residency targets v7x's
    # 64 MiB VMEM only for toy tables like this one.
    vmem = lambda: pl.BlockSpec(memory_space=pltpu.MemorySpace.VMEM)
    n_inputs = 5 + 5 + 1 + 5 + 1

    kernel = functools.partial(user_encoder_kernel, out_dim=out_dim)
    packed = pl.pallas_call(
        kernel,
        out_shape=jax.ShapeDtypeStruct((B_pad, out_pad), jnp.float32),
        in_specs=[vmem() for _ in range(n_inputs)],
        out_specs=vmem(),
    )(*idx,
      emb_users, emb_age, emb_gender, emb_occupation, emb_zip,
      bias_row, *W_parts, b_pad)

    user_vec = packed[:B, :out_dim]
    user_bias = packed[:B, out_dim]
    return user_vec, user_bias


def reference(user_id, age, gender, occupation, zip_area,
              emb_users, emb_age, emb_gender, emb_occupation, emb_zip,
              bias_user, W, b):
    x = jnp.concatenate(
        [emb_users[user_id], emb_age[age], emb_gender[gender],
         emb_occupation[occupation], emb_zip[zip_area]], axis=1)
    x = jnp.maximum(x, 0.0)
    user_vec = x @ W + b
    user_bias = bias_user[user_id]
    return user_vec, user_bias


if __name__ == "__main__":
    # Small, deterministic problem sizes.
    B = 8
    num_users, d_user = 32, 16
    num_ages, d_age = 8, 4
    num_genders, d_gender = 2, 4
    num_occupations, d_occ = 16, 4
    num_zip_areas, d_zip = 10, 4
    common_dim = 32
    fc_in = d_user + d_age + d_gender + d_occ + d_zip  # 32

    key = jax.random.PRNGKey(0)
    ks = jax.random.split(key, 16)

    # Parameters (deterministic synthetic init).
    emb_users = 0.1 * jax.random.normal(ks[0], (num_users, d_user), jnp.float32)
    emb_age = 0.1 * jax.random.normal(ks[1], (num_ages, d_age), jnp.float32)
    emb_gender = 0.1 * jax.random.normal(ks[2], (num_genders, d_gender), jnp.float32)
    emb_occupation = 0.1 * jax.random.normal(ks[3], (num_occupations, d_occ), jnp.float32)
    emb_zip = 0.1 * jax.random.normal(ks[4], (num_zip_areas, d_zip), jnp.float32)
    bias_user = 0.1 * jax.random.normal(ks[5], (num_users,), jnp.float32)
    W = 0.1 * jax.random.normal(ks[6], (fc_in, common_dim), jnp.float32)
    b = 0.1 * jax.random.normal(ks[7], (common_dim,), jnp.float32)

    # Inputs (categorical indices).
    user_id = jax.random.randint(ks[8], (B,), 0, num_users).astype(jnp.int32)
    age = jax.random.randint(ks[9], (B,), 0, num_ages).astype(jnp.int32)
    gender = jax.random.randint(ks[10], (B,), 0, num_genders).astype(jnp.int32)
    occupation = jax.random.randint(ks[11], (B,), 0, num_occupations).astype(jnp.int32)
    zip_area = jax.random.randint(ks[12], (B,), 0, num_zip_areas).astype(jnp.int32)

    args = (user_id, age, gender, occupation, zip_area,
            emb_users, emb_age, emb_gender, emb_occupation, emb_zip,
            bias_user, W, b)

    user_vec, user_bias = user_encoder(*args)
    jax.block_until_ready((user_vec, user_bias))

    ref_vec, ref_bias = reference(*args)
    assert user_vec.shape == (B, common_dim) and user_bias.shape == (B,)
    assert jnp.allclose(user_vec, ref_vec, atol=2e-5, rtol=2e-5)
    assert jnp.allclose(user_bias, ref_bias, atol=1e-6, rtol=1e-6)

    print("KERNEL_OK")
</pallas_src>

<mosaic_0001>
module attributes {stable_mosaic.version = 11 : i64} {
  func.func @user_encoder_kernel(%arg0: memref<8x1xi32, #tpu.memory_space<vmem>>, %arg1: memref<8x1xi32, #tpu.memory_space<vmem>>, %arg2: memref<8x1xi32, #tpu.memory_space<vmem>>, %arg3: memref<8x1xi32, #tpu.memory_space<vmem>>, %arg4: memref<8x1xi32, #tpu.memory_space<vmem>>, %arg5: memref<32x16xf32, #tpu.memory_space<vmem>>, %arg6: memref<8x4xf32, #tpu.memory_space<vmem>>, %arg7: memref<2x4xf32, #tpu.memory_space<vmem>>, %arg8: memref<16x4xf32, #tpu.memory_space<vmem>>, %arg9: memref<10x4xf32, #tpu.memory_space<vmem>>, %arg10: memref<1x32xf32, #tpu.memory_space<vmem>>, %arg11: memref<16x128xf32, #tpu.memory_space<vmem>>, %arg12: memref<4x128xf32, #tpu.memory_space<vmem>>, %arg13: memref<4x128xf32, #tpu.memory_space<vmem>>, %arg14: memref<4x128xf32, #tpu.memory_space<vmem>>, %arg15: memref<4x128xf32, #tpu.memory_space<vmem>>, %arg16: memref<1x128xf32, #tpu.memory_space<vmem>>, %arg17: memref<8x128xf32, #tpu.memory_space<vmem>>) attributes {dimension_semantics = [], scalar_prefetch = 0 : i64, scratch_operands = 0 : i64, tpu.core_type = #tpu.core_type<tc>} {
    %0 = tpu.iota {dimensions = array<i32: 1>} : vector<8x32xi32>
    %c0 = arith.constant 0 : index
    %c0_0 = arith.constant 0 : index
    %1 = vector.load %arg0[%c0, %c0_0] : memref<8x1xi32, #tpu.memory_space<vmem>>, vector<8x1xi32>
    %2 = vector.broadcast %1 : vector<8x1xi32> to vector<8x32xi32>
    %3 = arith.cmpi eq, %0, %2 : vector<8x32xi32>
    %4 = arith.extui %3 : vector<8x32xi1> to vector<8x32xi32>
    %5 = arith.sitofp %4 : vector<8x32xi32> to vector<8x32xf32>
    %c0_1 = arith.constant 0 : index
    %c0_2 = arith.constant 0 : index
    %6 = vector.load %arg5[%c0_1, %c0_2] : memref<32x16xf32, #tpu.memory_space<vmem>>, vector<32x16xf32>
    %cst = arith.constant dense<0.000000e+00> : vector<8x16xf32>
    %7 = tpu.matmul %5, %6, %cst {dimension_numbers = #tpu.dot_dimension_numbers<[1], [0], [0], [1], [0, 0, 1, 1], [], []>} : vector<8x32xf32>, vector<32x16xf32>, vector<8x16xf32> -> vector<8x16xf32>
    %cst_3 = arith.constant 0.000000e+00 : f32
    %8 = vector.broadcast %cst_3 : f32 to vector<8x16xf32>
    %9 = arith.maximumf %7, %8 : vector<8x16xf32>
    %c0_4 = arith.constant 0 : index
    %c0_5 = arith.constant 0 : index
    %10 = vector.load %arg11[%c0_4, %c0_5] : memref<16x128xf32, #tpu.memory_space<vmem>>, vector<16x128xf32>
    %cst_6 = arith.constant dense<0.000000e+00> : vector<8x128xf32>
    %11 = tpu.matmul %9, %10, %cst_6 {dimension_numbers = #tpu.dot_dimension_numbers<[1], [0], [0], [1], [0, 0, 1, 1], [], []>} : vector<8x16xf32>, vector<16x128xf32>, vector<8x128xf32> -> vector<8x128xf32>
    %12 = tpu.iota {dimensions = array<i32: 1>} : vector<8x8xi32>
    %c0_7 = arith.constant 0 : index
    %c0_8 = arith.constant 0 : index
    %13 = vector.load %arg1[%c0_7, %c0_8] : memref<8x1xi32, #tpu.memory_space<vmem>>, vector<8x1xi32>
    %14 = vector.broadcast %13 : vector<8x1xi32> to vector<8x8xi32>
    %15 = arith.cmpi eq, %12, %14 : vector<8x8xi32>
    %16 = arith.extui %15 : vector<8x8xi1> to vector<8x8xi32>
    %17 = arith.sitofp %16 : vector<8x8xi32> to vector<8x8xf32>
    %c0_9 = arith.constant 0 : index
    %c0_10 = arith.constant 0 : index
    %18 = vector.load %arg6[%c0_9, %c0_10] : memref<8x4xf32, #tpu.memory_space<vmem>>, vector<8x4xf32>
    %cst_11 = arith.constant dense<0.000000e+00> : vector<8x4xf32>
    %19 = tpu.matmul %17, %18, %cst_11 {dimension_numbers = #tpu.dot_dimension_numbers<[1], [0], [0], [1], [0, 0, 1, 1], [], []>} : vector<8x8xf32>, vector<8x4xf32>, vector<8x4xf32> -> vector<8x4xf32>
    %cst_12 = arith.constant 0.000000e+00 : f32
    %20 = vector.broadcast %cst_12 : f32 to vector<8x4xf32>
    %21 = arith.maximumf %19, %20 : vector<8x4xf32>
    %c0_13 = arith.constant 0 : index
    %c0_14 = arith.constant 0 : index
    %22 = vector.load %arg12[%c0_13, %c0_14] : memref<4x128xf32, #tpu.memory_space<vmem>>, vector<4x128xf32>
    %cst_15 = arith.constant dense<0.000000e+00> : vector<8x128xf32>
    %23 = tpu.matmul %21, %22, %cst_15 {dimension_numbers = #tpu.dot_dimension_numbers<[1], [0], [0], [1], [0, 0, 1, 1], [], []>} : vector<8x4xf32>, vector<4x128xf32>, vector<8x128xf32> -> vector<8x128xf32>
    %24 = arith.addf %11, %23 : vector<8x128xf32>
    %25 = tpu.iota {dimensions = array<i32: 1>} : vector<8x2xi32>
    %c0_16 = arith.constant 0 : index
    %c0_17 = arith.constant 0 : index
    %26 = vector.load %arg2[%c0_16, %c0_17] : memref<8x1xi32, #tpu.memory_space<vmem>>, vector<8x1xi32>
    %27 = vector.broadcast %26 : vector<8x1xi32> to vector<8x2xi32>
    %28 = arith.cmpi eq, %25, %27 : vector<8x2xi32>
    %29 = arith.extui %28 : vector<8x2xi1> to vector<8x2xi32>
    %30 = arith.sitofp %29 : vector<8x2xi32> to vector<8x2xf32>
    %c0_18 = arith.constant 0 : index
    %c0_19 = arith.constant 0 : index
    %31 = vector.load %arg7[%c0_18, %c0_19] : memref<2x4xf32, #tpu.memory_space<vmem>>, vector<2x4xf32>
    %cst_20 = arith.constant dense<0.000000e+00> : vector<8x4xf32>
    %32 = tpu.matmul %30, %31, %cst_20 {dimension_numbers = #tpu.dot_dimension_numbers<[1], [0], [0], [1], [0, 0, 1, 1], [], []>} : vector<8x2xf32>, vector<2x4xf32>, vector<8x4xf32> -> vector<8x4xf32>
    %cst_21 = arith.constant 0.000000e+00 : f32
    %33 = vector.broadcast %cst_21 : f32 to vector<8x4xf32>
    %34 = arith.maximumf %32, %33 : vector<8x4xf32>
    %c0_22 = arith.constant 0 : index
    %c0_23 = arith.constant 0 : index
    %35 = vector.load %arg13[%c0_22, %c0_23] : memref<4x128xf32, #tpu.memory_space<vmem>>, vector<4x128xf32>
    %cst_24 = arith.constant dense<0.000000e+00> : vector<8x128xf32>
    %36 = tpu.matmul %34, %35, %cst_24 {dimension_numbers = #tpu.dot_dimension_numbers<[1], [0], [0], [1], [0, 0, 1, 1], [], []>} : vector<8x4xf32>, vector<4x128xf32>, vector<8x128xf32> -> vector<8x128xf32>
    %37 = arith.addf %24, %36 : vector<8x128xf32>
    %38 = tpu.iota {dimensions = array<i32: 1>} : vector<8x16xi32>
    %c0_25 = arith.constant 0 : index
    %c0_26 = arith.constant 0 : index
    %39 = vector.load %arg3[%c0_25, %c0_26] : memref<8x1xi32, #tpu.memory_space<vmem>>, vector<8x1xi32>
    %40 = vector.broadcast %39 : vector<8x1xi32> to vector<8x16xi32>
    %41 = arith.cmpi eq, %38, %40 : vector<8x16xi32>
    %42 = arith.extui %41 : vector<8x16xi1> to vector<8x16xi32>
    %43 = arith.sitofp %42 : vector<8x16xi32> to vector<8x16xf32>
    %c0_27 = arith.constant 0 : index
    %c0_28 = arith.constant 0 : index
    %44 = vector.load %arg8[%c0_27, %c0_28] : memref<16x4xf32, #tpu.memory_space<vmem>>, vector<16x4xf32>
    %cst_29 = arith.constant dense<0.000000e+00> : vector<8x4xf32>
    %45 = tpu.matmul %43, %44, %cst_29 {dimension_numbers = #tpu.dot_dimension_numbers<[1], [0], [0], [1], [0, 0, 1, 1], [], []>} : vector<8x16xf32>, vector<16x4xf32>, vector<8x4xf32> -> vector<8x4xf32>
    %cst_30 = arith.constant 0.000000e+00 : f32
    %46 = vector.broadcast %cst_30 : f32 to vector<8x4xf32>
    %47 = arith.maximumf %45, %46 : vector<8x4xf32>
    %c0_31 = arith.constant 0 : index
    %c0_32 = arith.constant 0 : index
    %48 = vector.load %arg14[%c0_31, %c0_32] : memref<4x128xf32, #tpu.memory_space<vmem>>, vector<4x128xf32>
    %cst_33 = arith.constant dense<0.000000e+00> : vector<8x128xf32>
    %49 = tpu.matmul %47, %48, %cst_33 {dimension_numbers = #tpu.dot_dimension_numbers<[1], [0], [0], [1], [0, 0, 1, 1], [], []>} : vector<8x4xf32>, vector<4x128xf32>, vector<8x128xf32> -> vector<8x128xf32>
    %50 = arith.addf %37, %49 : vector<8x128xf32>
    %51 = tpu.iota {dimensions = array<i32: 1>} : vector<8x10xi32>
    %c0_34 = arith.constant 0 : index
    %c0_35 = arith.constant 0 : index
    %52 = vector.load %arg4[%c0_34, %c0_35] : memref<8x1xi32, #tpu.memory_space<vmem>>, vector<8x1xi32>
    %53 = vector.broadcast %52 : vector<8x1xi32> to vector<8x10xi32>
    %54 = arith.cmpi eq, %51, %53 : vector<8x10xi32>
    %55 = arith.extui %54 : vector<8x10xi1> to vector<8x10xi32>
    %56 = arith.sitofp %55 : vector<8x10xi32> to vector<8x10xf32>
    %c0_36 = arith.constant 0 : index
    %c0_37 = arith.constant 0 : index
    %57 = vector.load %arg9[%c0_36, %c0_37] : memref<10x4xf32, #tpu.memory_space<vmem>>, vector<10x4xf32>
    %cst_38 = arith.constant dense<0.000000e+00> : vector<8x4xf32>
    %58 = tpu.matmul %56, %57, %cst_38 {dimension_numbers = #tpu.dot_dimension_numbers<[1], [0], [0], [1], [0, 0, 1, 1], [], []>} : vector<8x10xf32>, vector<10x4xf32>, vector<8x4xf32> -> vector<8x4xf32>
    %cst_39 = arith.constant 0.000000e+00 : f32
    %59 = vector.broadcast %cst_39 : f32 to vector<8x4xf32>
    %60 = arith.maximumf %58, %59 : vector<8x4xf32>
    %c0_40 = arith.constant 0 : index
    %c0_41 = arith.constant 0 : index
    %61 = vector.load %arg15[%c0_40, %c0_41] : memref<4x128xf32, #tpu.memory_space<vmem>>, vector<4x128xf32>
    %cst_42 = arith.constant dense<0.000000e+00> : vector<8x128xf32>
    %62 = tpu.matmul %60, %61, %cst_42 {dimension_numbers = #tpu.dot_dimension_numbers<[1], [0], [0], [1], [0, 0, 1, 1], [], []>} : vector<8x4xf32>, vector<4x128xf32>, vector<8x128xf32> -> vector<8x128xf32>
    %63 = arith.addf %50, %62 : vector<8x128xf32>
    %c0_43 = arith.constant 0 : index
    %c0_44 = arith.constant 0 : index
    %64 = vector.load %arg16[%c0_43, %c0_44] : memref<1x128xf32, #tpu.memory_space<vmem>>, vector<1x128xf32>
    %65 = vector.broadcast %64 : vector<1x128xf32> to vector<8x128xf32>
    %66 = arith.addf %63, %65 : vector<8x128xf32>
    %c0_45 = arith.constant 0 : index
    %c0_46 = arith.constant 0 : index
    %67 = vector.load %arg10[%c0_45, %c0_46] : memref<1x32xf32, #tpu.memory_space<vmem>>, vector<1x32xf32>
    %cst_47 = arith.constant 0.000000e+00 : f32
    %68 = vector.shape_cast %67 : vector<1x32xf32> to vector<1x32xf32>
    %69 = vector.broadcast %68 : vector<1x32xf32> to vector<8x32xf32>
    %70 = vector.broadcast %cst_47 : f32 to vector<8x32xf32>
    %71 = arith.select %3, %69, %70 : vector<8x32xi1>, vector<8x32xf32>
    %cst_48 = arith.constant dense<0.000000e+00> : vector<8xf32>
    %72 = vector.multi_reduction <add>, %71, %cst_48 [1] : vector<8x32xf32> to vector<8xf32>
    %73 = vector.shape_cast %72 : vector<8xf32> to vector<8x1xf32>
    %74 = tpu.iota {dimensions = array<i32: 1>} : vector<1x128xi32>
    %c32_i32 = arith.constant 32 : i32
    %75 = vector.broadcast %c32_i32 : i32 to vector<1x128xi32>
    %76 = arith.cmpi eq, %74, %75 : vector<1x128xi32>
    %cst_49 = arith.constant 0.000000e+00 : f32
    %77 = vector.shape_cast %76 : vector<1x128xi1> to vector<1x128xi1>
    %78 = vector.broadcast %77 : vector<1x128xi1> to vector<8x128xi1>
    %79 = vector.shape_cast %73 : vector<8x1xf32> to vector<8x1xf32>
    %80 = vector.broadcast %79 : vector<8x1xf32> to vector<8x128xf32>
    %81 = vector.broadcast %cst_49 : f32 to vector<8x128xf32>
    %82 = arith.select %78, %80, %81 : vector<8x128xi1>, vector<8x128xf32>
    %83 = arith.addf %66, %82 : vector<8x128xf32>
    %c0_50 = arith.constant 0 : index
    %c0_51 = arith.constant 0 : index
    %84 = vector.load %arg17[%c0_50, %c0_51] : memref<8x128xf32, #tpu.memory_space<vmem>>, vector<8x128xf32>
    tpu.vector_store %arg17[%c0_50, %c0_51], %83 {strides = array<i32>} : memref<8x128xf32, #tpu.memory_space<vmem>>, vector<8x128xf32>,
    return
  }
}

</mosaic_0001>

<bundles_post_ra>
// kernel: tpu_custom_call.1
= control target key start
LH: loop header
LB: loop body
LE: loop exit
PB: predicated region body
PF: predicated region fallthrough
CT: control target
= control target key end

     0   :  { %s1279_s0 = inlined_call_operand.vmem [shape: s32[8,1], index: 0, kind: input, shape index: {}]   ;;  %s1280_s1 = inlined_call_operand.vmem [shape: s32[8,1], index: 1, kind: input, shape index: {}]   ;;  %s1281_s2 = inlined_call_operand.vmem [shape: s32[8,1], index: 2, kind: input, shape index: {}]   ;;  %s1282_s3 = inlined_call_operand.vmem [shape: s32[8,1], index: 3, kind: input, shape index: {}]   ;;  %s1283_s4 = inlined_call_operand.vmem [shape: s32[8,1], index: 4, kind: input, shape index: {}]   ;;  %s1284_s5 = inlined_call_operand.vmem [shape: f32[32,16], index: 5, kind: input, shape index: {}]   ;;  %s1285_s6 = inlined_call_operand.vmem [shape: f32[8,4], index: 6, kind: input, shape index: {}]   ;;  %s1286_s7 = inlined_call_operand.vmem [shape: f32[2,4], index: 7, kind: input, shape index: {}]   ;;  %s1287_s8 = inlined_call_operand.vmem [shape: f32[16,4], index: 8, kind: input, shape index: {}]   ;;  %s1288_s9 = inlined_call_operand.vmem [shape: f32[10,4], index: 9, kind: input, shape index: {}]   ;;  %s1289_s10 = inlined_call_operand.vmem [shape: f32[1,32], index: 10, kind: input, shape index: {}]   ;;  %s1290_s11 = inlined_call_operand.vmem [shape: f32[16,128], index: 11, kind: input, shape index: {}]   ;;  %s1291_s12 = inlined_call_operand.vmem [shape: f32[4,128], index: 12, kind: input, shape index: {}]   ;;  %s1292_s13 = inlined_call_operand.vmem [shape: f32[4,128], index: 13, kind: input, shape index: {}]   ;;  %s1293_s14 = inlined_call_operand.vmem [shape: f32[4,128], index: 14, kind: input, shape index: {}]   ;;  %s1294_s15 = inlined_call_operand.vmem [shape: f32[4,128], index: 15, kind: input, shape index: {}]   ;;  %s1295_s16 = inlined_call_operand.vmem [shape: f32[1,128], index: 16, kind: input, shape index: {}]   ;;  %s1296_s17 = inlined_call_operand.hbm [shape: f32[8,128], index: 17, kind: output, shape index: {}]  }
   0x1   :  { %1297 = sst [smem:[#allocation5_spill]] %s1279_s0 }
   0x2   :  { %1298 = sst [smem:[#allocation6_spill]] %s1280_s1 }
   0x3   :  { %s1299_s26 = sld [smem:[#allocation6_spill]]  ;;  %v383_v1 = vld [vmem:[%s1281_s2] sm:$0xff]  ;;  %v1052_v2 = vmov 0   ;;  %v69_v3 = vld [vmem:[%s1284_s5 + $0x18] sm:$0xff]  ;;  %v1053_v7 = vmov 0.0  }
   0x4   :  { %1028 = vset.pattern.permute.xlu0 %v1052_v2  ;;  %1029 = vset.pattern.permute.xlu1 %v1052_v2  ;;  %v154_v4 = vld [vmem:[%s1285_s6] sm:$0xff]  ;;  %s1300_s20 = sld [smem:[#allocation5_spill]] }
   0x5   :  { %385 = vperm.xlu1 %1029, %v383_v1   ;;  %v548_v6 = vld [vmem:[%s1282_s3] sm:$0xff]  ;;  %962 = vmatprep.subr.mxu0 %v1053_v7 }
   0x6   :  { %973 = vmatprep.subr.mxu1 %v1053_v7 }
   0x9   :  { %v147_v0 = vld [vmem:[%s1299_s26] sm:$0xff] }
   0xa   :  { %149 = vperm.xlu0 %1028, %v147_v0   ;;  %v59_v5 = vld [vmem:[%s1300_s20] sm:$0xff] }
   0xb   :  { %22 = vsyncpa [#allocation3], 0  ;;  %963 = vmatpush3.msra.mxu0 %v69_v3  ;;  %v68_v8 = vld [vmem:[%s1284_s5 + $0x10] sm:$0xff]  ;;  %974 = vmatpush3.msra.mxu1 %v154_v4  ;;  %vm1054_vm0 = vmmov 0   ;;  %v67_v9 = vld [vmem:[%s1284_s5 + $0x8] sm:$0xff]  ;;  %v57_v12 = vlaneseq  ;;  %vm155_vm1 = vcmask 64512  }
   0xc   :  { %964 = vmatprep.subr.mxu0 %v1053_v7  ;;  %975 = vmatprep.mubr.msk.f32.mxu1 %vm1054_vm0, %v1053_v7  ;;  %v709_v10 = vld [vmem:[%s1283_s4] sm:$0xff]  ;;  %vm70_vm3 = vcmask 261120   ;;  %vm395_vm6 = vcmask 1041408   ;;  %vm391_vm7 = vcmask 15360   ;;  %v556_v25 = vld [vmem:[%s1287_s8 + $0x8] sm:$0xff]  ;;  %vm309_vm9 = vcmask 130048  }
   0xd   :  { %550 = vperm.xlu1 %1029, %v548_v6   ;;  %965 = vmatpush3.msra.mxu0 %v68_v8  ;;  %v66_v11 = vld [vmem:[%s1284_s5] sm:$0xff]  ;;  %v1187_v13 = vand.u32 127, %v57_v12  ;;  %v717_v28 = vld [vmem:[%s1288_s9 + $0x8] sm:$0x3]  ;;  %vm718_vm11 = vcmask 80896   ;;  %vm235_vm12 = vcmask 1043456  }
   0xe   :  { %61 = vperm.xlu0 %1028, %v59_v5   ;;  %970 = vmatprep.mubr.msk.f32.mxu0 %vm1054_vm0, %v1053_v7  ;;  %v935_v17 = vld [vmem:[%s1289_s10] ss:$0 sm:$0xff]  ;;  %vm231_vm13 = vcmask 31744   ;;  %v146_v35 = vld [vmem:[%s1290_s11 + $0x8] sm:$0xff]  ;;  %s1055_s25 = smov [#allocation2]  }
   0xf   :  { %966 = vmatprep.subr.mxu0 %v1053_v7  ;;  %978 = vmatprep.subr.mxu1 %v1053_v7  ;;  %v390_v19 = vld [vmem:[%s1286_s7] sm:$0x3]  ;;  %vm893_vm14 = vcmp.eq.s32.totalorder %v1187_v13, 32  ;;  %s905_s26 = sshll.u32 %s1055_s25, 4  ;;  %s906_s26 = int_to_ptr.vmem [resolvable:$true] %s905_s26 }
  0x10   :  { %967 = vmatpush3.msra.mxu0 %v67_v9  ;;  %v555_v26 = vld [vmem:[%s1287_s8] sm:$0xff]  ;;  %s1030_s27 = scalar_lea.vmem %s906_s26, 128  ;;  %p1035_p1 = scmp.lt.s32.totalorder %s906_s26, %s906_s26 }
  0x11   :  { %968 = vmatprep.subr.mxu0 %v1053_v7  ;;  %v716_v30 = vld [vmem:[%s1288_s9] sm:$0xff]  ;;  %p1031_p0 = scmp.ne.s32.totalorder %s906_s26, %s1030_s27  ;;  %p1036_p2 = scmp.lt.s32.totalorder %s1030_s27, %s1030_s27 }
  0x12   :  { %711 = vperm.xlu0 %1028, %v709_v10   ;;  %969 = vmatpush3.msra.mxu0 %v66_v11  ;;  %v230_v32 = vld [vmem:[%s1291_s12] sm:$0xf] }
  0x13   :  { %990 = vmatprep.subr.mxu0 %v1053_v7  ;;  %v145_v37 = vld [vmem:[%s1290_s11] sm:$0xff]  ;;  %p1037_p3 = por %p1036_p2, %p1035_p1 }
  0x14   :  { %v470_v40 = vld [vmem:[%s1292_s13] sm:$0xf] }
  0x15   :  { %v631_v44 = vld [vmem:[%s1293_s14] sm:$0xf]  ;;  %p1038_p4 = pnand %p1037_p3, %p1031_p0 }
  0x16   :  { %v796_v48 = vld [vmem:[%s1294_s15] sm:$0xf] }
  0x17   :  { %v934_v1 = vld [vmem:[%s1295_s16] ss:$0 sm:$0xff] }
  0x80   :  { %v386_v16 = vpop.permute.xlu1 %385 }
  0x81   :  { %vm387_vm4 = vcmp.eq.s32.totalorder %v1187_v13, %v386_v16 }
  0x82   :  { %v920_v23 = vsel %vm387_vm4, 1.0, %v1053_v7 }
  0x85   :  { %v150_v14 = vpop.permute.xlu0 %149 }
  0x86   :  { %vm151_vm2 = vcmp.eq.s32.totalorder %v1187_v13, %v150_v14 }
  0x87   :  { %v915_v15 = vsel %vm151_vm2, 1.0, %v1053_v7 }
  0x88   :  { %976 = vmatmul.mubr.msk.f32.vlgmr.msra.gmra.mxu1 %vm155_vm1, %v915_v15  ;;  %v551_v24 = vpop.permute.xlu1 %550 }
  0x89   :  { %v62_v18 = vpop.permute.xlu0 %61  ;;  %980 = vmatprep.mubr.msk.f32.mxu1 %vm1054_vm0, %v1053_v7  ;;  %vm552_vm8 = vcmp.eq.s32.totalorder %v1187_v13, %v551_v24  ;;  %979 = vmatpush3.msk.msra.mxu1 %vm235_vm12, %v230_v32 }
  0x8a   :  { %vm63_vm5 = vcmp.eq.s32.totalorder %v1187_v13, %v62_v18  ;;  %v925_v29 = vsel %vm552_vm8, 1.0, %v1053_v7  ;;  %983 = vmatprep.subr.mxu1 %v1053_v7 }
  0x8b   :  { %v913_v20 = vsel %vm63_vm5, 1.0, %v1053_v7  ;;  %v889_v21 = vsel %vm63_vm5, %v935_v17, 0.0 }
  0x8c   :  { %971 = vmatmul.mubr.msk.f32.vlgmr.msra.gmra.mxu0 %vm70_vm3, %v913_v20  ;;  %v890_v22 = vsel %vm70_vm3, %v889_v21, 0.0 }
  0x8d   :  { %991 = vmatpush3.msk.msra.mxu0 %vm395_vm6, %v390_v19  ;;  %891 = vadd.xlane.f32.xlu1 %v890_v22  ;;  %v712_v27 = vpop.permute.xlu0 %711 }
  0x8e   :  { %992 = vmatprep.mubr.msk.f32.mxu0 %vm1054_vm0, %v1053_v7  ;;  %1000 = vmatprep.subr.mxu0 %v1053_v7  ;;  %vm713_vm10 = vcmp.eq.s32.totalorder %v1187_v13, %v712_v27 }
  0x8f   :  { %v929_v31 = vsel %vm713_vm10, 1.0, %v1053_v7 }
  0x90   :  { %993 = vmatmul.mubr.msk.f32.vlgmr.msra.gmra.mxu0 %vm391_vm7, %v920_v23 }
  0x91   :  { %1001 = vmatpush3.msra.mxu0 %v556_v25  ;;  %1004 = vmatprep.mubr.msk.f32.mxu0 %vm1054_vm0, %v1053_v7 }
  0x92   :  { %1002 = vmatprep.subr.mxu0 %v1053_v7 }
  0x93   :  { %1003 = vmatpush3.msra.mxu0 %v555_v26 }
  0x94   :  { %1012 = vmatprep.subr.mxu0 %v1053_v7  ;;  %1005 = vmatmul.mubr.msk.f32.vlgmr.msra.gmra.mxu0 %vm309_vm9, %v925_v29 }
  0x95   :  { %1013 = vmatpush3.msk.msra.mxu0 %vm395_vm6, %v717_v28  ;;  %1016 = vmatprep.mubr.msk.f32.mxu0 %vm1054_vm0, %v1053_v7 }
  0x96   :  { %1014 = vmatprep.subr.mxu0 %v1053_v7 }
  0x97   :  { %1015 = vmatpush3.msra.mxu0 %v716_v30 }
  0x98   :  { %1017 = vmatmul.mubr.msk.f32.vlgmr.msra.gmra.mxu0 %vm718_vm11, %v929_v31 }
 0x116   :  { %v892_v2 = vpop.xlane.xlu1 %891 }
 0x117   :  { %v896_v6 = vsel %vm893_vm14, %v892_v2, 0.0 }
 0x148   :  { %v225_v33 = vpop.f32.mrf.mxu1 }
 0x149   :  { %v229_v34 = vmax.f32 %v225_v33, 0.0 }
 0x14a   :  { %v977_v36 = vpop.f32.mrf.mxu1 }
 0x14b   :  { %981 = vmatmul.mubr.msk.f32.vlgmr.msra.gmra.mxu1 %vm231_vm13, %v229_v34 }
 0x14c   :  { %984 = vmatpush3.msra.mxu1 %v146_v35  ;;  %v140_v38 = vpop.f32.mrf.mxu0  ;;  %987 = vmatprep.mubr.msk.f32.mxu1 %vm1054_vm0, %v1053_v7 }
 0x14d   :  { %v144_v39 = vmax.f32 %v140_v38, 0.0  ;;  %985 = vmatprep.subr.mxu1 %v1053_v7 }
 0x14e   :  { %986 = vmatpush3.msra.mxu1 %v145_v37  ;;  %v972_v41 = vpop.f32.mrf.mxu0 }
 0x14f   :  { %995 = vmatprep.subr.mxu1 %v1053_v7  ;;  %988 = vmatmul.mubr.msk.f32.vlgmr.msra.gmra.mxu1 %vm309_vm9, %v144_v39 }
 0x150   :  { %996 = vmatpush3.msk.msra.mxu1 %vm235_vm12, %v470_v40  ;;  %v465_v42 = vpop.f32.mrf.mxu0  ;;  %997 = vmatprep.mubr.msk.f32.mxu1 %vm1054_vm0, %v1053_v7 }
 0x151   :  { %v469_v43 = vmax.f32 %v465_v42, 0.0  ;;  %1007 = vmatprep.subr.mxu1 %v1053_v7 }
 0x152   :  { %v994_v45 = vpop.f32.mrf.mxu0 }
 0x153   :  { %998 = vmatmul.mubr.msk.f32.vlgmr.msra.gmra.mxu1 %vm231_vm13, %v469_v43 }
 0x154   :  { %1008 = vmatpush3.msk.msra.mxu1 %vm235_vm12, %v631_v44  ;;  %v626_v46 = vpop.f32.mrf.mxu0  ;;  %1009 = vmatprep.mubr.msk.f32.mxu1 %vm1054_vm0, %v1053_v7 }
 0x155   :  { %v630_v47 = vmax.f32 %v626_v46, 0.0  ;;  %1019 = vmatprep.subr.mxu1 %v1053_v7 }
 0x156   :  { %v1006_v49 = vpop.f32.mrf.mxu0 }
 0x157   :  { %1010 = vmatmul.mubr.msk.f32.vlgmr.msra.gmra.mxu1 %vm231_vm13, %v630_v47 }
 0x158   :  { %1020 = vmatpush3.msk.msra.mxu1 %vm235_vm12, %v796_v48  ;;  %v791_v50 = vpop.f32.mrf.mxu0  ;;  %1021 = vmatprep.mubr.msk.f32.mxu1 %vm1054_vm0, %v1053_v7 }
 0x159   :  { %v795_v51 = vmax.f32 %v791_v50, 0.0 }
 0x15a   :  { %v1018_v52 = vpop.f32.mrf.mxu0 }
 0x15b   :  { %1022 = vmatmul.mubr.msk.f32.vlgmr.msra.gmra.mxu1 %vm231_vm13, %v795_v51 }
 0x20b   :  { %v305_v53 = vpop.f32.mrf.mxu1 }
 0x20d   :  { %v982_v54 = vpop.f32.mrf.mxu1 }
 0x20f   :  { %v379_v55 = vpop.f32.mrf.mxu1 }
 0x210   :  { %v380_v59 = vadd.f32 %v379_v55, %v305_v53 }
 0x211   :  { %v989_v56 = vpop.f32.mrf.mxu1 }
 0x213   :  { %v543_v57 = vpop.f32.mrf.mxu1 }
 0x214   :  { %v547_v61 = vadd.f32 %v543_v57, %v380_v59 }
 0x215   :  { %v999_v58 = vpop.f32.mrf.mxu1 }
 0x217   :  { %v704_v60 = vpop.f32.mrf.mxu1 }
 0x218   :  { %v708_v63 = vadd.f32 %v704_v60, %v547_v61 }
 0x219   :  { %v1011_v62 = vpop.f32.mrf.mxu1 }
 0x21b   :  { %v869_v0 = vpop.f32.mrf.mxu1 }
 0x21c   :  { %v873_v3 = vadd.f32 %v869_v0, %v708_v63 }
 0x21d   :  { %v1023_v4 = vpop.f32.mrf.mxu1 }
 0x21e   :  { %v881_v5 = vadd.f32 %v934_v1, %v873_v3 }
 0x220   :  { %v897_v7 = vadd.f32 %v896_v6, %v881_v5 }
 0x222   :  { %898 = vst [vmem:[#allocation2] sm:$0xff] %v897_v7 }
 0x223   :  { %1041 = shalt.err (!%p1038_p4)
}
 0x224   :  { %908 = dma.vmem_to_hbm [thread:$0]  %s906_s26, 128, %s1296_s17, [#allocation3]  }
 0x225   :  { %1050 = dma.done.wait [#allocation3], 128  }
 0x226   :  { %1051 = vsyncadd [#allocation3], 4294967168 }
 0x227   :  { %912 = vsyncpa [#allocation3], 1 }

</bundles_post_ra>
